<compile_context>
chip_gen: v5e
topology: v5e:2x2
jax: 0.10.0
libtpu: 0.0.40
codegen_flags: <defaults>
</compile_context>

<pallas_src>
import functools

import jax
import jax.numpy as jnp
from jax.experimental import pallas as pl
from jax.experimental.pallas import tpu as pltpu


def _temporal_attention_kernel(h_ref, uds_ref, w1h_ref, w2_ref, out_ref, *, batch):
    # h_ref  : (H, B*T)  encoder states, flat lane index = t*B + b (time-major)
    # uds_ref: (H, B*T)  time-invariant (W1_d @ d_b + W1_s @ s_b + b1), pre-tiled
    # w1h_ref: (H, H)    W1 columns that multiply h
    # w2_ref : (1, H)    second linear weight as a row
    # out_ref: (1, B*T)  beta, lane-dense (unmasked stores)
    bt = h_ref.shape[1]                      # B*T (static)

    # ---- linear1 (h part): single lane-dense MXU matmul, + precomputed d/s/b1.
    v = jnp.dot(w1h_ref[...], h_ref[...], preferred_element_type=jnp.float32)
    v = v + uds_ref[...]                     # (H, B*T)
    tv = jnp.tanh(v)                         # (H, B*T), full-width VPU/EUP

    # ---- linear2 (H -> 1) as an MXU matvec.  b2 dropped: softmax shift-invariant.
    e = jnp.dot(w2_ref[...], tv, preferred_element_type=jnp.float32)   # (1, B*T)

    # ---- softmax over time, segmented per batch (segments = lanes with equal i % B).
    # Global max is exact for softmax (constant shift within each segment) and
    # safe here because |e| is bounded by ||w2||_1 (tanh-bounded activations).
    m = jnp.max(e, axis=-1, keepdims=True)   # (1, 1)
    p = jnp.exp(e - m)                       # (1, B*T)

    # Segment one-hot: S[i, b] = (i % B == b).  Segmented sum and its broadcast
    # back onto the lane axis are two tiny MXU matvecs (no reshape/relayout).
    row = jax.lax.broadcasted_iota(jnp.int32, (bt, batch), 0) % batch
    col = jax.lax.broadcasted_iota(jnp.int32, (bt, batch), 1)
    seg = (row == col).astype(jnp.float32)                              # (B*T, B)
    denom_b = jnp.dot(p, seg, preferred_element_type=jnp.float32)       # (1, B)

    row_t = jax.lax.broadcasted_iota(jnp.int32, (batch, bt), 0)
    col_t = jax.lax.broadcasted_iota(jnp.int32, (batch, bt), 1) % batch
    seg_t = (row_t == col_t).astype(jnp.float32)                        # (B, B*T)
    denom = jnp.dot(denom_b, seg_t, preferred_element_type=jnp.float32) # (1, B*T)

    # Exact division so the per-batch betas sum to 1 to f32 precision.
    out_ref[...] = p / denom


def temporal_attention(d, s, h, w1, b1, w2, b2):
    """d, s: (1, B, H) or (B, H); h: (T, B, H).
    w1: (H, 3H), b1: (H,), w2: (1, H), b2: (1,).
    Returns beta: (T, B, 1) == softmax(linear2(tanh(linear1(cat([h,d,s],-1)))), dim=0)."""
    T, B, H = h.shape
    assert w1.shape == (H, 3 * H) and w2.shape == (1, H)

    d2 = d.reshape(B, H).astype(jnp.float32)
    s2 = s.reshape(B, H).astype(jnp.float32)
    w1f = w1.astype(jnp.float32)
    w1_h, w1_d, w1_s = w1f[:, :H], w1f[:, H:2 * H], w1f[:, 2 * H:]

    # Time-invariant d/s contribution, computed once per batch row.
    uds = d2 @ w1_d.T + s2 @ w1_s.T + b1.astype(jnp.float32)            # (B, H)
    # Pre-tile over time in the flattened time-major lane order t*B + b.
    uds_slab = jnp.tile(uds.T, (1, T))                                  # (H, B*T)

    # h: (T, B, H) -> (H, T*B) with lane index t*B + b (free reshape + one transpose).
    h_slab = h.astype(jnp.float32).reshape(T * B, H).T                  # (H, T*B)
    w2_row = w2.reshape(1, H).astype(jnp.float32)                       # (1, H)
    # b2 is intentionally not passed: adding a constant to every logit is a
    # no-op under the softmax.

    kernel = functools.partial(_temporal_attention_kernel, batch=B)

    out = pl.pallas_call(
        kernel,
        out_shape=jax.ShapeDtypeStruct((1, T * B), jnp.float32),
        grid_spec=pltpu.PrefetchScalarGridSpec(
            num_scalar_prefetch=0,
            grid=(1,),                                                  # single step
            in_specs=[
                pl.BlockSpec((H, T * B), lambda i: (0, 0)),             # h slab
                pl.BlockSpec((H, T * B), lambda i: (0, 0)),             # uds slab
                pl.BlockSpec((H, H), lambda i: (0, 0)),                 # W1_h
                pl.BlockSpec((1, H), lambda i: (0, 0)),                 # W2 row
            ],
            out_specs=pl.BlockSpec((1, T * B), lambda i: (0, 0)),       # lane-dense
        ),
    )(h_slab, uds_slab, w1_h, w2_row)

    # Flat lane index is t*B + b, so the torch layout falls out of a free reshape.
    return out.reshape(T, B, 1)                                         # (T, B, 1)


def _reference(d, s, h, w1, b1, w2, b2):
    # Pure-JAX replica of the torch forward for a correctness check.
    T, B, H = h.shape
    db = jnp.broadcast_to(d.reshape(1, B, H), (T, B, H))
    sb = jnp.broadcast_to(s.reshape(1, B, H), (T, B, H))
    v = jnp.concatenate([h, db, sb], axis=-1) @ w1.T + b1               # (T, B, H)
    l = jnp.tanh(v) @ w2.T + b2                                         # (T, B, 1)
    return jax.nn.softmax(l, axis=0)                                    # (T, B, 1)


if __name__ == "__main__":
    T, B, H = 16, 16, 32        # time steps, batch, hidden_size

    key = jax.random.PRNGKey(0)
    k_h, k_d, k_s, k_w1, k_b1, k_w2, k_b2 = jax.random.split(key, 7)

    h = jax.random.normal(k_h, (T, B, H), dtype=jnp.float32)
    d = jax.random.normal(k_d, (1, B, H), dtype=jnp.float32)
    s = jax.random.normal(k_s, (1, B, H), dtype=jnp.float32)

    # PyTorch-style uniform(-1/sqrt(fan_in), +1/sqrt(fan_in)) init.
    bound1 = 1.0 / jnp.sqrt(jnp.float32(3 * H))
    bound2 = 1.0 / jnp.sqrt(jnp.float32(H))
    w1 = jax.random.uniform(k_w1, (H, 3 * H), jnp.float32, -bound1, bound1)
    b1 = jax.random.uniform(k_b1, (H,), jnp.float32, -bound1, bound1)
    w2 = jax.random.uniform(k_w2, (1, H), jnp.float32, -bound2, bound2)
    b2 = jax.random.uniform(k_b2, (1,), jnp.float32, -bound2, bound2)

    ta = jax.jit(temporal_attention)            # fold wrapper XLA ops into one dispatch
    beta = jax.block_until_ready(ta(d, s, h, w1, b1, w2, b2))

    ref = _reference(d, s, h, w1, b1, w2, b2)
    assert beta.shape == (T, B, 1)
    assert jnp.allclose(beta, ref, atol=1e-4, rtol=1e-4)
    # Exact division in the epilogue: per-batch weights sum to 1 to f32 precision.
    assert jnp.allclose(jnp.sum(beta, axis=0), 1.0, atol=1e-4)

    print("KERNEL_OK")
</pallas_src>

<mosaic_0001>
module attributes {stable_mosaic.version = 11 : i64} {
  func.func @_temporal_attention_kernel(%arg0: i32, %arg1: memref<32x256xf32, #tpu.memory_space<vmem>>, %arg2: memref<32x256xf32, #tpu.memory_space<vmem>>, %arg3: memref<32x32xf32, #tpu.memory_space<vmem>>, %arg4: memref<1x32xf32, #tpu.memory_space<vmem>>, %arg5: memref<1x256xf32, #tpu.memory_space<vmem>>) attributes {dimension_semantics = [#tpu.dimension_semantics<arbitrary>], iteration_bounds = array<i64: 1>, scalar_prefetch = 0 : i64, scratch_operands = 0 : i64, tpu.core_type = #tpu.core_type<tc>, window_params = [{pipeline_mode = #tpu.pipeline_mode<synchronous>, transform_indices = @transform_0, window_bounds = array<i64: 32, 256>}, {pipeline_mode = #tpu.pipeline_mode<synchronous>, transform_indices = @transform_1, window_bounds = array<i64: 32, 256>}, {pipeline_mode = #tpu.pipeline_mode<synchronous>, transform_indices = @transform_2, window_bounds = array<i64: 32, 32>}, {pipeline_mode = #tpu.pipeline_mode<synchronous>, transform_indices = @transform_3, window_bounds = array<i64: 1, 32>}, {pipeline_mode = #tpu.pipeline_mode<synchronous>, transform_indices = @transform_4, window_bounds = array<i64: 1, 256>}]} {
    %c0 = arith.constant 0 : index
    %c0_0 = arith.constant 0 : index
    %0 = vector.load %arg3[%c0, %c0_0] : memref<32x32xf32, #tpu.memory_space<vmem>>, vector<32x32xf32>
    %c0_1 = arith.constant 0 : index
    %c0_2 = arith.constant 0 : index
    %1 = vector.load %arg1[%c0_1, %c0_2] : memref<32x256xf32, #tpu.memory_space<vmem>>, vector<32x256xf32>
    %cst = arith.constant dense<0.000000e+00> : vector<32x256xf32>
    %2 = tpu.matmul %0, %1, %cst {dimension_numbers = #tpu.dot_dimension_numbers<[1], [0], [0], [1], [0, 0, 1, 1], [], []>} : vector<32x32xf32>, vector<32x256xf32>, vector<32x256xf32> -> vector<32x256xf32>
    %c0_3 = arith.constant 0 : index
    %c0_4 = arith.constant 0 : index
    %3 = vector.load %arg2[%c0_3, %c0_4] : memref<32x256xf32, #tpu.memory_space<vmem>>, vector<32x256xf32>
    %4 = arith.addf %2, %3 : vector<32x256xf32>
    %5 = math.tanh %4 : vector<32x256xf32>
    %c0_5 = arith.constant 0 : index
    %c0_6 = arith.constant 0 : index
    %6 = vector.load %arg4[%c0_5, %c0_6] : memref<1x32xf32, #tpu.memory_space<vmem>>, vector<1x32xf32>
    %cst_7 = arith.constant dense<0.000000e+00> : vector<1x256xf32>
    %7 = tpu.matmul %6, %5, %cst_7 {dimension_numbers = #tpu.dot_dimension_numbers<[1], [0], [0], [1], [0, 0, 1, 1], [], []>} : vector<1x32xf32>, vector<32x256xf32>, vector<1x256xf32> -> vector<1x256xf32>
    %cst_8 = arith.constant dense<0xFF800000> : vector<1xf32>
    %8 = vector.multi_reduction <maximumf>, %7, %cst_8 [1] : vector<1x256xf32> to vector<1xf32>
    %9 = vector.shape_cast %8 : vector<1xf32> to vector<1x1xf32>
    %10 = vector.broadcast %9 : vector<1x1xf32> to vector<1x256xf32>
    %11 = arith.subf %7, %10 : vector<1x256xf32>
    %12 = math.exp %11 : vector<1x256xf32>
    %13 = tpu.iota {dimensions = array<i32: 0>} : vector<256x16xi32>
    %c16_i32 = arith.constant 16 : i32
    %c0_i32 = arith.constant 0 : i32
    %14 = arith.cmpi eq, %c16_i32, %c0_i32 : i32
    %c1_i32 = arith.constant 1 : i32
    %15 = arith.select %14, %c1_i32, %c16_i32 : i32
    %16 = vector.broadcast %15 : i32 to vector<256x16xi32>
    %17 = arith.remsi %13, %16 : vector<256x16xi32>
    %c0_i32_9 = arith.constant 0 : i32
    %18 = vector.broadcast %c0_i32_9 : i32 to vector<256x16xi32>
    %19 = arith.cmpi ne, %17, %18 : vector<256x16xi32>
    %c0_i32_10 = arith.constant 0 : i32
    %20 = vector.broadcast %c0_i32_10 : i32 to vector<256x16xi32>
    %21 = arith.cmpi slt, %17, %20 : vector<256x16xi32>
    %c0_i32_11 = arith.constant 0 : i32
    %22 = arith.cmpi slt, %15, %c0_i32_11 : i32
    %23 = vector.broadcast %22 : i1 to vector<256x16xi1>
    %24 = vector.broadcast %23 : vector<256x16xi1> to vector<256x16xi1>
    %25 = arith.xori %21, %24 : vector<256x16xi1>
    %26 = arith.andi %25, %19 : vector<256x16xi1>
    %27 = vector.broadcast %15 : i32 to vector<256x16xi32>
    %28 = arith.addi %17, %27 : vector<256x16xi32>
    %29 = arith.select %26, %28, %17 : vector<256x16xi1>, vector<256x16xi32>
    %30 = tpu.iota {dimensions = array<i32: 1>} : vector<256x16xi32>
    %31 = arith.cmpi eq, %29, %30 : vector<256x16xi32>
    %32 = arith.extui %31 : vector<256x16xi1> to vector<256x16xi32>
    %33 = arith.sitofp %32 : vector<256x16xi32> to vector<256x16xf32>
    %cst_12 = arith.constant dense<0.000000e+00> : vector<1x16xf32>
    %34 = tpu.matmul %12, %33, %cst_12 {dimension_numbers = #tpu.dot_dimension_numbers<[1], [0], [0], [1], [0, 0, 1, 1], [], []>} : vector<1x256xf32>, vector<256x16xf32>, vector<1x16xf32> -> vector<1x16xf32>
    %35 = tpu.iota {dimensions = array<i32: 0>} : vector<16x256xi32>
    %36 = tpu.iota {dimensions = array<i32: 1>} : vector<16x256xi32>
    %c16_i32_13 = arith.constant 16 : i32
    %c0_i32_14 = arith.constant 0 : i32
    %37 = arith.cmpi eq, %c16_i32_13, %c0_i32_14 : i32
    %c1_i32_15 = arith.constant 1 : i32
    %38 = arith.select %37, %c1_i32_15, %c16_i32_13 : i32
    %39 = vector.broadcast %38 : i32 to vector<16x256xi32>
    %40 = arith.remsi %36, %39 : vector<16x256xi32>
    %c0_i32_16 = arith.constant 0 : i32
    %41 = vector.broadcast %c0_i32_16 : i32 to vector<16x256xi32>
    %42 = arith.cmpi ne, %40, %41 : vector<16x256xi32>
    %c0_i32_17 = arith.constant 0 : i32
    %43 = vector.broadcast %c0_i32_17 : i32 to vector<16x256xi32>
    %44 = arith.cmpi slt, %40, %43 : vector<16x256xi32>
    %c0_i32_18 = arith.constant 0 : i32
    %45 = arith.cmpi slt, %38, %c0_i32_18 : i32
    %46 = vector.broadcast %45 : i1 to vector<16x256xi1>
    %47 = vector.broadcast %46 : vector<16x256xi1> to vector<16x256xi1>
    %48 = arith.xori %44, %47 : vector<16x256xi1>
    %49 = arith.andi %48, %42 : vector<16x256xi1>
    %50 = vector.broadcast %38 : i32 to vector<16x256xi32>
    %51 = arith.addi %40, %50 : vector<16x256xi32>
    %52 = arith.select %49, %51, %40 : vector<16x256xi1>, vector<16x256xi32>
    %53 = arith.cmpi eq, %35, %52 : vector<16x256xi32>
    %54 = arith.extui %53 : vector<16x256xi1> to vector<16x256xi32>
    %55 = arith.sitofp %54 : vector<16x256xi32> to vector<16x256xf32>
    %cst_19 = arith.constant dense<0.000000e+00> : vector<1x256xf32>
    %56 = tpu.matmul %34, %55, %cst_19 {dimension_numbers = #tpu.dot_dimension_numbers<[1], [0], [0], [1], [0, 0, 1, 1], [], []>} : vector<1x16xf32>, vector<16x256xf32>, vector<1x256xf32> -> vector<1x256xf32>
    %57 = arith.divf %12, %56 : vector<1x256xf32>
    %c0_20 = arith.constant 0 : index
    %c0_21 = arith.constant 0 : index
    %58 = vector.load %arg5[%c0_20, %c0_21] : memref<1x256xf32, #tpu.memory_space<vmem>>, vector<1x256xf32>
    tpu.vector_store %arg5[%c0_20, %c0_21], %57 {strides = array<i32>} : memref<1x256xf32, #tpu.memory_space<vmem>>, vector<1x256xf32>,
    return
  }
  func.func @transform_0(%arg0: i32) -> (i32, i32) {
    %c0_i32 = arith.constant 0 : i32
    %c0_i32_0 = arith.constant 0 : i32
    %c0_i32_1 = arith.constant 0 : i32
    return %c0_i32, %c0_i32_0 : i32, i32
  }
  func.func @transform_1(%arg0: i32) -> (i32, i32) {
    %c0_i32 = arith.constant 0 : i32
    %c0_i32_0 = arith.constant 0 : i32
    %c0_i32_1 = arith.constant 0 : i32
    return %c0_i32, %c0_i32_0 : i32, i32
  }
  func.func @transform_2(%arg0: i32) -> (i32, i32) {
    %c0_i32 = arith.constant 0 : i32
    %c0_i32_0 = arith.constant 0 : i32
    %c0_i32_1 = arith.constant 0 : i32
    return %c0_i32, %c0_i32_0 : i32, i32
  }
  func.func @transform_3(%arg0: i32) -> (i32, i32) {
    %c0_i32 = arith.constant 0 : i32
    %c0_i32_0 = arith.constant 0 : i32
    %c0_i32_1 = arith.constant 0 : i32
    return %c0_i32, %c0_i32_0 : i32, i32
  }
  func.func @transform_4(%arg0: i32) -> (i32, i32) {
    %c0_i32 = arith.constant 0 : i32
    %c0_i32_0 = arith.constant 0 : i32
    %c0_i32_1 = arith.constant 0 : i32
    return %c0_i32, %c0_i32_0 : i32, i32
  }
}

</mosaic_0001>

<bundles_post_ra>
// kernel: temporal_attention.1
= control target key start
LH: loop header
LB: loop body
LE: loop exit
PB: predicated region body
PF: predicated region fallthrough
CT: control target
= control target key end

     0   :  { %vm37_vm0 = vcmask 261120   ;;  %v172_v45 = vlaneseq  ;;  %s1209_s0 = inlined_call_operand.vmem [shape: f32[32,256], index: 0, kind: input, shape index: {}]   ;;  %s1210_s2 = inlined_call_operand.vmem [shape: f32[32,32], index: 2, kind: input, shape index: {}]   ;;  %s1211_s1 = inlined_call_operand.vmem [shape: f32[32,256], index: 1, kind: input, shape index: {}]   ;;  %s1212_s3 = inlined_call_operand.vmem [shape: f32[1,32], index: 3, kind: input, shape index: {}]   ;;  %s1213_s4 = inlined_call_operand.vmem [shape: f32[1,256], index: 4, kind: output, shape index: {}]  }
   0x1   :  { %v27_v0 = vld [vmem:[%s1209_s0 + $0x30] sm:$0xff]  ;;  %v28_v1 = vld [vmem:[%s1209_s0 + $0x38] sm:$0xff]  ;;  %v25_v2 = vld [vmem:[%s1209_s0 + $0x20] sm:$0xff] }
   0x2   :  { %62 = vmatpush.msra.mxu0 %v27_v0  ;;  %91 = vmatpush.msra.mxu1 %v28_v1  ;;  %v26_v3 = vld [vmem:[%s1209_s0 + $0x28] sm:$0xff]  ;;  %v23_v4 = vld [vmem:[%s1209_s0 + $0x10] sm:$0xff]  ;;  %v24_v5 = vld [vmem:[%s1209_s0 + $0x18] sm:$0xff]  ;;  %v1061_v46 = vshrl.u32 %v172_v45, 7  ;;  %v1064_v47 = vand.u32 127, %v172_v45  ;;  %v961_v0 = vmov 1.0  }
   0x3   :  { %v21_v6 = vld [vmem:[%s1209_s0] sm:$0xff]  ;;  %v22_v7 = vld [vmem:[%s1209_s0 + $0x8] sm:$0xff]  ;;  %v19_v10 = vld [vmem:[%s1210_s2 + $0x10] sm:$0xff] }
   0x4   :  { %63 = vmatpush.msra.mxu0 %v25_v2  ;;  %92 = vmatpush.msra.mxu1 %v26_v3  ;;  %v17_v8 = vld [vmem:[%s1210_s2] sm:$0xff]  ;;  %v18_v9 = vld [vmem:[%s1210_s2 + $0x8] sm:$0xff]  ;;  %v20_v11 = vld [vmem:[%s1210_s2 + $0x18] sm:$0xff]  ;;  %v188_v48 = vadd.s32 120, %v1061_v46  ;;  %v204_v49 = vadd.s32 248, %v1061_v46  ;;  %v187_v50 = vadd.s32 112, %v1061_v46 }
   0x5   :  { %v33_v18 = vld [vmem:[%s1211_s1 + $0x20] sm:$0xff]  ;;  %v35_v19 = vld [vmem:[%s1211_s1 + $0x30] sm:$0xff]  ;;  %v36_v20 = vld [vmem:[%s1211_s1 + $0x38] sm:$0xff]  ;;  %v203_v51 = vadd.s32 240, %v1061_v46  ;;  %v186_v52 = vadd.s32 104, %v1061_v46  ;;  %v202_v53 = vadd.s32 232, %v1061_v46 }
   0x6   :  { %64 = vmatpush.msra.mxu0 %v23_v4  ;;  %93 = vmatpush.msra.mxu1 %v24_v5  ;;  %v34_v21 = vld [vmem:[%s1211_s1 + $0x28] sm:$0xff]  ;;  %v31_v22 = vld [vmem:[%s1211_s1 + $0x10] sm:$0xff]  ;;  %v32_v25 = vld [vmem:[%s1211_s1 + $0x18] sm:$0xff]  ;;  %v185_v54 = vadd.s32 96, %v1061_v46  ;;  %v201_v55 = vadd.s32 224, %v1061_v46  ;;  %v314_v56 = vand.u32 15, %v188_v48 }
   0x7   :  { %v29_v29 = vld [vmem:[%s1211_s1] sm:$0xff]  ;;  %v30_v31 = vld [vmem:[%s1211_s1 + $0x8] sm:$0xff]  ;;  %v426_v57 = vand.u32 15, %v204_v49  ;;  %v307_v58 = vand.u32 15, %v187_v50  ;;  %v419_v59 = vand.u32 15, %v203_v51  ;;  %v300_v60 = vand.u32 15, %v186_v52 }
   0x8   :  { %65 = vmatpush.msra.mxu0 %v21_v6  ;;  %94 = vmatpush.msra.mxu1 %v22_v7  ;;  %v116_v42 = vld [vmem:[%s1212_s3] sm:$0x1]  ;;  %v412_v61 = vand.u32 15, %v202_v53  ;;  %v293_v62 = vand.u32 15, %v185_v54  ;;  %v405_v63 = vand.u32 15, %v201_v55  ;;  %vm606_vm1 = vcmp.eq.s32.totalorder %v314_v56, %v1064_v47 }
   0x9   :  { %852 = vmatmul.msk.f32.vlgmr.msra.gmra.mxu0 %vm37_vm0, %v17_v8  ;;  %856 = vmatmul.msk.f32.vlgmr.msra.gmra.mxu1 %vm37_vm0, %v17_v8  ;;  %vm622_vm2 = vcmp.eq.s32.totalorder %v426_v57, %v1064_v47  ;;  %vm605_vm3 = vcmp.eq.s32.totalorder %v307_v58, %v1064_v47  ;;  %vm621_vm4 = vcmp.eq.s32.totalorder %v419_v59, %v1064_v47  ;;  %v184_v4 = vadd.s32 88, %v1061_v46 }
   0xa   :  { %894 = vmatpush.msk.msrb.mxu0 %vm606_vm1, %v961_v0  ;;  %910 = vmatpush.msk.msrb.mxu1 %vm622_vm2, %v961_v0  ;;  %vm1081_vm5 = vcmp.eq.s32.totalorder %v300_v60, %v1064_v47  ;;  %vm1086_vm6 = vcmp.eq.s32.totalorder %v412_v61, %v1064_v47  ;;  %vm1091_vm7 = vcmp.eq.s32.totalorder %v293_v62, %v1064_v47  ;;  %v200_v6 = vadd.s32 216, %v1061_v46 }
   0xb   :  { %vm1097_vm8 = vcmp.eq.s32.totalorder %v405_v63, %v1064_v47  ;;  %v183_v7 = vadd.s32 80, %v1061_v46  ;;  %v199_v8 = vadd.s32 208, %v1061_v46  ;;  %v191_v48 = vadd.s32 144, %v1061_v46 }
   0xc   :  { %895 = vmatpush.msk.msrb.mxu0 %vm605_vm3, %v961_v0  ;;  %911 = vmatpush.msk.msrb.mxu1 %vm621_vm4, %v961_v0  ;;  %v174_v53 = vadd.s32 8, %v1061_v46  ;;  %v190_v54 = vadd.s32 136, %v1061_v46  ;;  %v209_v55 = vand.u32 15, %v1061_v46  ;;  %v189_v56 = vadd.s32 128, %v1061_v46 }
   0xd   :  { %v335_v52 = vand.u32 15, %v191_v48  ;;  %v727_v60 = vadd.s32 128, %v1064_v47  ;;  %v732_v61 = vand.u32 15, %v1064_v47 }
   0xe   :  { %896 = vmatpush.msk.msrb.mxu0 %vm1081_vm5, %v961_v0  ;;  %912 = vmatpush.msk.msrb.mxu1 %vm1086_vm6, %v961_v0  ;;  %vm160_vm5 = vcmask 1040384   ;;  %v216_v57 = vand.u32 15, %v174_v53  ;;  %v328_v58 = vand.u32 15, %v190_v54  ;;  %v321_v59 = vand.u32 15, %v189_v56 }
   0xf   :  { %v739_v62 = vand.u32 15, %v727_v60 }
  0x10   :  { %897 = vmatpush.msk.msrb.mxu0 %vm1091_vm7, %v961_v0  ;;  %913 = vmatpush.msk.msrb.mxu1 %vm1097_vm8, %v961_v0 }
  0x11   :  { %853 = vmatmul.msk.f32.gmra.mxu0 %vm37_vm0, %v18_v9  ;;  %857 = vmatmul.msk.f32.gmra.mxu1 %vm37_vm0, %v18_v9  ;;  %v286_v9 = vand.u32 15, %v184_v4 }
  0x13   :  { %vm602_vm9 = vcmp.eq.s32.totalorder %v286_v9, %v1064_v47 }
  0x14   :  { %898 = vmatpush.msk.msrb.mxu0 %vm602_vm9, %v961_v0 }
  0x19   :  { %854 = vmatmul.msk.f32.gmra.mxu0 %vm37_vm0, %v19_v10  ;;  %858 = vmatmul.msk.f32.gmra.mxu1 %vm37_vm0, %v19_v10  ;;  %v182_v10 = vadd.s32 72, %v1061_v46 }
  0x21   :  { %855 = vmatmul.msk.f32.gmra.mxu0 %vm37_vm0, %v20_v11  ;;  %859 = vmatmul.msk.f32.gmra.mxu1 %vm37_vm0, %v20_v11  ;;  %v198_v11 = vadd.s32 200, %v1061_v46 }
  0x86   :  { %v67_v12 = vpop.f32.mrf.mxu0  ;;  %v96_v13 = vpop.f32.mrf.mxu1 }
  0x87   :  { %v68_v34 = vadd.f32 %v67_v12, %v29_v29  ;;  %v97_v35 = vadd.f32 %v96_v13, %v30_v31  ;;  %v181_v12 = vadd.s32 64, %v1061_v46  ;;  %v398_v13 = vand.u32 15, %v200_v6 }
  0x89   :  { %vm618_vm10 = vcmp.eq.s32.totalorder %v398_v13, %v1064_v47 }
  0x8a   :  { %914 = vmatpush.msk.msrb.mxu1 %vm618_vm10, %v961_v0 }
  0x8e   :  { %v70_v14 = vpop.f32.mrf.mxu0  ;;  %v99_v15 = vpop.f32.mrf.mxu1 }
  0x8f   :  { %v71_v32 = vadd.f32 %v70_v14, %v31_v22  ;;  %v100_v33 = vadd.f32 %v99_v15, %v32_v25  ;;  %v279_v14 = vand.u32 15, %v183_v7  ;;  %v391_v15 = vand.u32 15, %v199_v8 }
  0x90   :  { %v196_v22 = vadd.s32 184, %v1061_v46 }
  0x91   :  { %vm601_vm11 = vcmp.eq.s32.totalorder %v279_v14, %v1064_v47  ;;  %vm617_vm12 = vcmp.eq.s32.totalorder %v391_v15, %v1064_v47 }
  0x92   :  { %899 = vmatpush.msk.msrb.mxu0 %vm601_vm11, %v961_v0  ;;  %915 = vmatpush.msk.msrb.mxu1 %vm617_vm12, %v961_v0 }
  0x96   :  { %v73_v16 = vpop.f32.mrf.mxu0  ;;  %v102_v17 = vpop.f32.mrf.mxu1 }
  0x97   :  { %v74_v26 = vadd.f32 %v73_v16, %v33_v18  ;;  %v103_v30 = vadd.f32 %v102_v17, %v34_v21  ;;  %v197_v16 = vadd.s32 192, %v1061_v46  ;;  %v272_v17 = vand.u32 15, %v182_v10 }
  0x98   :  { %v384_v18 = vand.u32 15, %v198_v11 }
  0x99   :  { %v377_v21 = vand.u32 15, %v197_v16  ;;  %vm600_vm13 = vcmp.eq.s32.totalorder %v272_v17, %v1064_v47 }
  0x9a   :  { %vm616_vm14 = vcmp.eq.s32.totalorder %v384_v18, %v1064_v47  ;;  %900 = vmatpush.msk.msrb.mxu0 %vm600_vm13, %v961_v0  ;;  %vm609_vm13 = vcmp.eq.s32.totalorder %v335_v52, %v1064_v47 }
  0x9b   :  { %916 = vmatpush.msk.msrb.mxu1 %vm616_vm14, %v961_v0  ;;  %vm592_vm14 = vcmp.eq.s32.totalorder %v216_v57, %v1064_v47 }
  0x9e   :  { %v76_v23 = vpop.f32.mrf.mxu0  ;;  %v105_v24 = vpop.f32.mrf.mxu1 }
  0x9f   :  { %v77_v27 = vadd.f32 %v76_v23, %v35_v19  ;;  %v106_v28 = vadd.f32 %v105_v24, %v36_v20  ;;  %v265_v19 = vand.u32 15, %v181_v12  ;;  %v180_v20 = vadd.s32 56, %v1061_v46 }
  0xa0   :  { %v179_v23 = vadd.s32 48, %v1061_v46  ;;  %v195_v24 = vadd.s32 176, %v1061_v46 }
  0xa1   :  { %937 = vtanh.f32 %v77_v27  ;;  %v258_v25 = vand.u32 15, %v180_v20  ;;  %vm599_vm15 = vcmp.eq.s32.totalorder %v265_v19, %v1064_v47 }
  0xa2   :  { %939 = vtanh.f32 %v106_v28  ;;  %v251_v27 = vand.u32 15, %v179_v23  ;;  %v363_v28 = vand.u32 15, %v195_v24  ;;  %901 = vmatpush.msk.msrb.mxu0 %vm599_vm15, %v961_v0  ;;  %vm608_vm15 = vcmp.eq.s32.totalorder %v328_v58, %v1064_v47 }
  0xa3   :  { %941 = vtanh.f32 %v74_v26  ;;  %v370_v26 = vand.u32 15, %v196_v22  ;;  %vm598_vm1 = vcmp.eq.s32.totalorder %v258_v25, %v1064_v47 }
  0xa4   :  { %943 = vtanh.f32 %v103_v30  ;;  %vm597_vm3 = vcmp.eq.s32.totalorder %v251_v27, %v1064_v47  ;;  %vm613_vm4 = vcmp.eq.s32.totalorder %v363_v28, %v1064_v47  ;;  %902 = vmatpush.msk.msrb.mxu0 %vm598_vm1, %v961_v0  ;;  %vm607_vm1 = vcmp.eq.s32.totalorder %v321_v59, %v1064_v47 }
  0xa5   :  { %945 = vtanh.f32 %v71_v32  ;;  %vm614_vm2 = vcmp.eq.s32.totalorder %v370_v26, %v1064_v47 }
  0xa6   :  { %947 = vtanh.f32 %v100_v33  ;;  %903 = vmatpush.msk.msrb.mxu0 %vm597_vm3, %v961_v0  ;;  %vm755_vm3 = vcmp.eq.s32.totalorder %v174_v53, %v739_v62 }
  0xa7   :  { %v938_v36 = vpop.eup %937  ;;  %949 = vtanh.f32 %v68_v34  ;;  %v178_v34 = vadd.s32 40, %v1061_v46 }
  0xa8   :  { %v940_v37 = vpop.eup %939  ;;  %951 = vtanh.f32 %v97_v35  ;;  %132 = vmatpush.msra.mxu2 %v938_v36  ;;  %v194_v35 = vadd.s32 168, %v1061_v46 }
  0xa9   :  { %v942_v38 = vpop.eup %941  ;;  %152 = vmatpush.msra.mxu3 %v940_v37  ;;  %v244_v36 = vand.u32 15, %v178_v34 }
  0xaa   :  { %v944_v39 = vpop.eup %943  ;;  %133 = vmatpush.msra.mxu2 %v942_v38  ;;  %v356_v37 = vand.u32 15, %v194_v35  ;;  %v177_v38 = vadd.s32 32, %v1061_v46 }
  0xab   :  { %v946_v40 = vpop.eup %945  ;;  %153 = vmatpush.msra.mxu3 %v944_v39  ;;  %v193_v39 = vadd.s32 160, %v1061_v46  ;;  %vm596_vm6 = vcmp.eq.s32.totalorder %v244_v36, %v1064_v47 }
  0xac   :  { %v948_v41 = vpop.eup %947  ;;  %134 = vmatpush.msra.mxu2 %v946_v40  ;;  %vm612_vm7 = vcmp.eq.s32.totalorder %v356_v37, %v1064_v47  ;;  %v237_v40 = vand.u32 15, %v177_v38  ;;  %904 = vmatpush.msk.msrb.mxu0 %vm596_vm6, %v961_v0  ;;  %vm752_vm6 = vcmp.eq.s32.totalorder %v1061_v46, %v732_v61 }
  0xad   :  { %v950_v43 = vpop.eup %949  ;;  %154 = vmatpush.msra.mxu3 %v948_v41  ;;  %v349_v41 = vand.u32 15, %v193_v39 }
  0xae   :  { %v952_v44 = vpop.eup %951  ;;  %135 = vmatpush.msra.mxu2 %v950_v43  ;;  %v192_v43 = vadd.s32 152, %v1061_v46  ;;  %vm595_vm8 = vcmp.eq.s32.totalorder %v237_v40, %v1064_v47 }
  0xaf   :  { %155 = vmatpush.msra.mxu3 %v952_v44  ;;  %860 = vmatmul.msk.f32.vlgmr.msra.gmra.mxu2 %vm37_vm0, %v116_v42  ;;  %vm611_vm9 = vcmp.eq.s32.totalorder %v349_v41, %v1064_v47  ;;  %v175_v44 = vadd.s32 16, %v1061_v46 }
  0xb0   :  { %861 = vmatmul.msk.f32.vlgmr.msra.gmra.mxu3 %vm37_vm0, %v116_v42  ;;  %vm615_vm0 = vcmp.eq.s32.totalorder %v377_v21, %v1064_v47  ;;  %v176_v42 = vadd.s32 24, %v1061_v46  ;;  %905 = vmatpush.msk.msrb.mxu0 %vm595_vm8, %v961_v0  ;;  %v342_v50 = vand.u32 15, %v192_v43 }
  0xb1   :  { %917 = vmatpush.msk.msrb.mxu1 %vm615_vm0, %v961_v0  ;;  %v223_v51 = vand.u32 15, %v175_v44  ;;  %vm591_vm0 = vcmp.eq.s32.totalorder %v209_v55, %v1064_v47  ;;  %933 = vmatpush.msk.msrb.mxu3 %vm755_vm3, %v961_v0 }
  0xb2   :  { %v230_v49 = vand.u32 15, %v176_v42  ;;  %vm610_vm11 = vcmp.eq.s32.totalorder %v342_v50, %v1064_v47 }
  0xb3   :  { %918 = vmatpush.msk.msrb.mxu1 %vm614_vm2, %v961_v0  ;;  %vm593_vm12 = vcmp.eq.s32.totalorder %v223_v51, %v1064_v47  ;;  %vm754_vm2 = vcmp.eq.s32.totalorder %v174_v53, %v732_v61 }
  0xb4   :  { %vm594_vm10 = vcmp.eq.s32.totalorder %v230_v49, %v1064_v47  ;;  %930 = vmatpush.msk.msrb.mxu2 %vm754_vm2, %v961_v0 }
  0xb5   :  { %919 = vmatpush.msk.msrb.mxu1 %vm613_vm4, %v961_v0  ;;  %906 = vmatpush.msk.msrb.mxu0 %vm594_vm10, %v961_v0  ;;  %vm753_vm4 = vcmp.eq.s32.totalorder %v1061_v46, %v739_v62 }
  0xb6   :  { %934 = vmatpush.msk.msrb.mxu3 %vm753_vm4, %v961_v0  ;;  %931 = vmatpush.msk.msrb.mxu2 %vm752_vm6, %v961_v0 }
  0xb7   :  { %920 = vmatpush.msk.msrb.mxu1 %vm612_vm7, %v961_v0  ;;  %907 = vmatpush.msk.msrb.mxu0 %vm593_vm12, %v961_v0  ;;  %vm764_vm7 = vcmask 130048  }
  0xb9   :  { %921 = vmatpush.msk.msrb.mxu1 %vm611_vm9, %v961_v0  ;;  %908 = vmatpush.msk.msrb.mxu0 %vm592_vm14, %v961_v0 }
  0xbb   :  { %922 = vmatpush.msk.msrb.mxu1 %vm610_vm11, %v961_v0  ;;  %909 = vmatpush.msk.msrb.mxu0 %vm591_vm0, %v961_v0  ;;  %vm845_vm0 = vcmp.lt.s32.totalorder %v172_v45, 256 }
  0xbd   :  { %923 = vmatpush.msk.msrb.mxu1 %vm609_vm13, %v961_v0 }
  0xbf   :  { %924 = vmatpush.msk.msrb.mxu1 %vm608_vm15, %v961_v0 }
  0xc1   :  { %925 = vmatpush.msk.msrb.mxu1 %vm607_vm1, %v961_v0 }
 0x132   :  { %v1148_v29 = vpop.f32.mrf.mxu2 }
 0x133   :  { %v1152_v30 = vpop.f32.mrf.mxu3  ;;  %v161_v31 = vsel %vm160_vm5, %v1148_v29, -inf }
 0x134   :  { %v162_v32 = vsel %vm160_vm5, %v1152_v30, -inf }
 0x135   :  { %v163_v33 = vmax.f32 %v161_v31, %v162_v32 }
 0x137   :  { %164 = vmax.xlane.f32.xlu0 %v163_v33 }
 0x1aa   :  { %v165_v63 = vpop.xlane.xlu0 %164 }
 0x1ab   :  { %v166_v1 = vsub.f32 %v1148_v29, %v165_v63  ;;  %v167_v2 = vsub.f32 %v1152_v30, %v165_v63 }
 0x1ad   :  { %v168_v3 = vmul.f32 1.442695, %v166_v1  ;;  %v170_v4 = vmul.f32 1.442695, %v167_v2 }
 0x1af   :  { %953 = vpow2.f32 %v168_v3 }
 0x1b0   :  { %955 = vpow2.f32 %v170_v4 }
 0x1b5   :  { %v954_v47 = vpop.eup %953 }
 0x1b6   :  { %v956_v5 = vpop.eup %955  ;;  %703 = vmatmul.f32.vlgmr.msrb.gmra.mxu0 %v954_v47 }
 0x1b7   :  { %723 = vmatmul.f32.vlgmr.msrb.gmra.mxu1 %v956_v5 }
 0x233   :  { %v704_v6 = vpop.f32.mrf.mxu0 }
 0x234   :  { %v724_v7 = vpop.f32.mrf.mxu1 }
 0x235   :  { %v725_v8 = vadd.f32 %v724_v7, %v704_v6 }
 0x237   :  { %932 = vmatmul.msk.f32.vlgmr.msrb.gmra.mxu2 %vm764_vm7, %v725_v8  ;;  %935 = vmatmul.msk.f32.vlgmr.msrb.gmra.mxu3 %vm764_vm7, %v725_v8 }
 0x2ba   :  { %v785_v9 = vpop.f32.mrf.mxu2  ;;  %v805_v10 = vpop.f32.mrf.mxu3 }
 0x2bb   :  { %957 = vrcp.f32 %v785_v9  ;;  %v819_v46 = vand.u32 2147483648, %v785_v9  ;;  %v834_v0 = vand.u32 2147483648, %v805_v10  ;;  %v817_v18 = vand.u32 2147483647, %v785_v9 }
 0x2bc   :  { %959 = vrcp.f32 %v805_v10  ;;  %v832_v20 = vand.u32 2147483647, %v805_v10  ;;  %vm813_vm10 = vweird.f32 %v785_v9  ;;  %vm828_vm12 = vweird.f32 %v805_v10 }
 0x2bd   :  { %v820_v24 = vor.u32 1.1754944e-38, %v819_v46  ;;  %v835_v25 = vor.u32 1.1754944e-38, %v834_v0  ;;  %vm818_vm14 = vcmp.eq.f32.partialorder %v817_v18, 8.507059e+37 }
 0x2be   :  { %vm833_vm15 = vcmp.eq.f32.partialorder %v832_v20, 8.507059e+37 }
 0x2c1   :  { %v958_v11 = vpop.eup %957 }
 0x2c2   :  { %v960_v12 = vpop.eup %959  ;;  %v809_v13 = vmul.f32 %v958_v11, %v785_v9  ;;  %vm814_vm8 = vweird.f32 %v958_v11 }
 0x2c3   :  { %v824_v14 = vmul.f32 %v960_v12, %v805_v10  ;;  %vm829_vm9 = vweird.f32 %v960_v12  ;;  %vm815_vm11 = vmor %vm813_vm10, %vm814_vm8 }
 0x2c4   :  { %v810_v15 = vsub.f32 1.0, %v809_v13  ;;  %vm830_vm13 = vmor %vm828_vm12, %vm829_vm9 }
 0x2c5   :  { %v825_v16 = vsub.f32 1.0, %v824_v14 }
 0x2c6   :  { %v811_v17 = vmul.f32 %v958_v11, %v810_v15 }
 0x2c7   :  { %v826_v19 = vmul.f32 %v960_v12, %v825_v16 }
 0x2c8   :  { %v812_v21 = vadd.f32 %v958_v11, %v811_v17 }
 0x2c9   :  { %v827_v22 = vadd.f32 %v960_v12, %v826_v19 }
 0x2ca   :  { %v816_v23 = vsel %vm815_vm11, %v958_v11, %v812_v21 }
 0x2cb   :  { %v831_v26 = vsel %vm830_vm13, %v960_v12, %v827_v22  ;;  %v821_v27 = vsel %vm818_vm14, %v820_v24, %v816_v23 }
 0x2cc   :  { %v836_v28 = vsel %vm833_vm15, %v835_v25, %v831_v26  ;;  %v822_v30 = vmul.f32 %v954_v47, %v821_v27 }
 0x2cd   :  { %v837_v29 = vmul.f32 %v956_v5, %v836_v28 }
 0x2cf   :  { %v840_v31 = vrot.slane %v837_v29, 7 }
 0x2d1   :  { %v841_v32 = vsel %vm160_vm5, %v822_v30, %v840_v31 }
 0x2d2   :  { %847 = vst.msk [vmem:[%s1213_s4] sm:$0x3] %vm845_vm0, %v841_v32 }

</bundles_post_ra>
